<compile_context>
chip_gen: v7x
topology: tpu7x:2x2x1
jax: 0.10.0
libtpu: 0.0.40
codegen_flags: <defaults>
</compile_context>

<pallas_src>
import functools

import jax
import jax.numpy as jnp
from jax.experimental import pallas as pl
from jax.experimental.pallas import tpu as pltpu

EPS = 1e-5


def _ln_linear_kernel(x_ref, w_ref, b_ref, o_ref):
    # x_ref: (row_tile, E) rows; w_ref: (E, col_tile) fused (gamma-scaled)
    # weights in bf16; b_ref: (1, col_tile) fused bias in f32;
    # o_ref: (row_tile, col_tile).
    x = x_ref[...].astype(jnp.float32)

    # LayerNorm statistics over the full last dim (biased variance, like
    # nn.LayerNorm).  gamma/beta are already folded into W/b by the wrapper.
    mean = jnp.mean(x, axis=-1, keepdims=True)
    xc = x - mean
    var = jnp.mean(xc * xc, axis=-1, keepdims=True)
    y = xc * jax.lax.rsqrt(var + EPS)

    # fn(y): Linear — bf16 operands on the MXU, f32 accumulation.
    y = y.astype(w_ref.dtype)
    out = jnp.dot(y, w_ref[...], preferred_element_type=jnp.float32)
    out = out + b_ref[...]

    o_ref[...] = out.astype(o_ref.dtype)


@functools.partial(jax.jit,
                   static_argnames=("row_tile", "col_tile", "matmul_dtype"))
def with_layer_norm(x, gamma, beta, w, b, *,
                    row_tile=512, col_tile=None,
                    matmul_dtype=jnp.bfloat16):
    """x: [B, S, E] -> [B, S, E].  LayerNorm(E) followed by Linear(E, E)."""
    B, S, E = x.shape
    rows = B * S
    x2 = x.reshape(rows, E)

    # Fold the LN affine transform into the linear layer (f32 math, then cast
    # the weight once to the MXU dtype).
    w_f32 = w.astype(jnp.float32)
    w_fused = (gamma.astype(jnp.float32)[:, None] * w_f32).astype(matmul_dtype)
    b_fused = (beta.astype(jnp.float32) @ w_f32
               + b.astype(jnp.float32)).reshape(1, E)

    # --- Tile sizing ---------------------------------------------------------
    # Rows: multiple of 8 (f32 sublane), capped at the row count; sweep 256-1024
    # in production.  Columns: full E when small, else 512-wide 128-aligned
    # blocks so the resident W slice stays bounded (v7x VMEM) and the output
    # stores are lane-dense.
    row_tile = min(row_tile, rows)
    row_tile = max(8, ((row_tile + 7) // 8) * 8)
    if col_tile is None:
        col_tile = E if (E <= 512 or E % 128 != 0) else 512
    col_tile = min(col_tile, E)

    grid = (pl.cdiv(rows, row_tile), pl.cdiv(E, col_tile))

    out = pl.pallas_call(
        _ln_linear_kernel,
        out_shape=jax.ShapeDtypeStruct((rows, E), x.dtype),
        grid_spec=pl.GridSpec(
            grid=grid,
            in_specs=[
                # x rows: full E so the LN reduction sees the whole row.  The
                # block index is constant across the column axis (inner-most
                # grid dim), so the tile is not re-fetched per column block.
                pl.BlockSpec((row_tile, E), lambda i, j: (i, 0)),
                # Fused (gamma-scaled) weight column block, bf16.
                pl.BlockSpec((E, col_tile), lambda i, j: (0, j)),
                # Fused bias column block, f32.
                pl.BlockSpec((1, col_tile), lambda i, j: (0, j)),
            ],
            out_specs=pl.BlockSpec((row_tile, col_tile), lambda i, j: (i, j)),
        ),
        compiler_params=pltpu.CompilerParams(
            # Both axes are independent (no reduction axis) -> megacore can
            # shard them on v7x.
            dimension_semantics=("parallel", "parallel"),
            # Above the 16/32 MiB default scoped limit; still leaves headroom
            # under v7x's 64 MiB physical VMEM.
            vmem_limit_bytes=48 << 20,
        ),
    )(x2, w_fused, b_fused)
    return out.reshape(B, S, E)


def _reference(x, gamma, beta, w, b):
    """Pure-JAX f32 reference matching nn.LayerNorm + nn.Linear."""
    xf = x.astype(jnp.float32)
    mean = jnp.mean(xf, axis=-1, keepdims=True)
    var = jnp.mean((xf - mean) ** 2, axis=-1, keepdims=True)
    y = (xf - mean) * jax.lax.rsqrt(var + EPS) * gamma + beta
    return (y @ w + b).astype(x.dtype)


if __name__ == "__main__":
    # Small shapes, but E is 128-aligned (lane-dense stores, full MXU lanes)
    # and rows > row_tile so the grid has multiple pipelined steps.
    B, S, E = 2, 256, 128

    key = jax.random.PRNGKey(0)
    kx, kg, kbt, kw, kb = jax.random.split(key, 5)

    x = jax.random.normal(kx, (B, S, E), dtype=jnp.float32)

    # Non-trivial LayerNorm affine so the gamma/beta folding is exercised.
    gamma = 1.0 + 0.1 * jax.random.normal(kg, (E,), dtype=jnp.float32)
    beta = 0.1 * jax.random.normal(kbt, (E,), dtype=jnp.float32)

    # fn = Linear(emb, emb) parameters, deterministic init.
    w = jax.random.normal(kw, (E, E), dtype=jnp.float32) * 0.02
    b = jax.random.normal(kb, (E,), dtype=jnp.float32) * 0.02

    # row_tile=128 just to exercise a multi-step grid at this tiny size;
    # production default is 512.
    out = with_layer_norm(x, gamma, beta, w, b, row_tile=128)
    out = jax.block_until_ready(out)

    ref = _reference(x, gamma, beta, w, b)
    assert out.shape == (B, S, E)
    # Tolerance sized for the bf16 matmul (f32 accumulation) vs. f32 reference.
    assert jnp.allclose(out, ref, atol=2e-2, rtol=2e-2), float(
        jnp.max(jnp.abs(out - ref)))

    print("KERNEL_OK")
</pallas_src>

<mosaic_0001>
module attributes {stable_mosaic.version = 11 : i64} {
  func.func @_ln_linear_kernel(%arg0: i32, %arg1: i32, %arg2: memref<128x128xf32, #tpu.memory_space<vmem>>, %arg3: memref<128x128xbf16, #tpu.memory_space<vmem>>, %arg4: memref<1x128xf32, #tpu.memory_space<vmem>>, %arg5: memref<128x128xf32, #tpu.memory_space<vmem>>) attributes {dimension_semantics = [#tpu.dimension_semantics<parallel>, #tpu.dimension_semantics<parallel>], iteration_bounds = array<i64: 4, 1>, scalar_prefetch = 0 : i64, scratch_operands = 0 : i64, tpu.core_type = #tpu.core_type<tc>, window_params = [{transform_indices = @transform_0, window_bounds = array<i64: 128, 128>}, {transform_indices = @transform_1, window_bounds = array<i64: 128, 128>}, {transform_indices = @transform_2, window_bounds = array<i64: 1, 128>}, {transform_indices = @transform_3, window_bounds = array<i64: 128, 128>}]} {
    %c0 = arith.constant 0 : index
    %c0_0 = arith.constant 0 : index
    %0 = vector.load %arg2[%c0, %c0_0] : memref<128x128xf32, #tpu.memory_space<vmem>>, vector<128x128xf32>
    %cst = arith.constant dense<0.000000e+00> : vector<128xf32>
    %1 = vector.multi_reduction <add>, %0, %cst [1] : vector<128x128xf32> to vector<128xf32>
    %2 = vector.shape_cast %1 : vector<128xf32> to vector<128x1xf32>
    %cst_1 = arith.constant 1.280000e+02 : f32
    %3 = vector.broadcast %cst_1 : f32 to vector<128x1xf32>
    %4 = arith.divf %2, %3 : vector<128x1xf32>
    %5 = vector.broadcast %4 : vector<128x1xf32> to vector<128x128xf32>
    %6 = arith.subf %0, %5 : vector<128x128xf32>
    %7 = arith.mulf %6, %6 : vector<128x128xf32>
    %cst_2 = arith.constant dense<0.000000e+00> : vector<128xf32>
    %8 = vector.multi_reduction <add>, %7, %cst_2 [1] : vector<128x128xf32> to vector<128xf32>
    %9 = vector.shape_cast %8 : vector<128xf32> to vector<128x1xf32>
    %cst_3 = arith.constant 1.280000e+02 : f32
    %10 = vector.broadcast %cst_3 : f32 to vector<128x1xf32>
    %11 = arith.divf %9, %10 : vector<128x1xf32>
    %cst_4 = arith.constant 9.99999974E-6 : f32
    %12 = vector.broadcast %cst_4 : f32 to vector<128x1xf32>
    %13 = arith.addf %11, %12 : vector<128x1xf32>
    %14 = math.rsqrt %13 : vector<128x1xf32>
    %15 = vector.broadcast %14 : vector<128x1xf32> to vector<128x128xf32>
    %16 = arith.mulf %6, %15 : vector<128x128xf32>
    %17 = arith.truncf %16 : vector<128x128xf32> to vector<128x128xbf16>
    %c0_5 = arith.constant 0 : index
    %c0_6 = arith.constant 0 : index
    %18 = vector.load %arg3[%c0_5, %c0_6] : memref<128x128xbf16, #tpu.memory_space<vmem>>, vector<128x128xbf16>
    %cst_7 = arith.constant dense<0.000000e+00> : vector<128x128xf32>
    %19 = tpu.matmul %17, %18, %cst_7 {dimension_numbers = #tpu.dot_dimension_numbers<[1], [0], [0], [1], [0, 0, 1, 1], [], []>} : vector<128x128xbf16>, vector<128x128xbf16>, vector<128x128xf32> -> vector<128x128xf32>
    %c0_8 = arith.constant 0 : index
    %c0_9 = arith.constant 0 : index
    %20 = vector.load %arg4[%c0_8, %c0_9] : memref<1x128xf32, #tpu.memory_space<vmem>>, vector<1x128xf32>
    %21 = vector.broadcast %20 : vector<1x128xf32> to vector<128x128xf32>
    %22 = arith.addf %19, %21 : vector<128x128xf32>
    %c0_10 = arith.constant 0 : index
    %c0_11 = arith.constant 0 : index
    %23 = vector.load %arg5[%c0_10, %c0_11] : memref<128x128xf32, #tpu.memory_space<vmem>>, vector<128x128xf32>
    tpu.vector_store %arg5[%c0_10, %c0_11], %22 {strides = array<i32>} : memref<128x128xf32, #tpu.memory_space<vmem>>, vector<128x128xf32>,
    return
  }
  func.func @transform_0(%arg0: i32, %arg1: i32) -> (i32, i32) {
    %c0_i32 = arith.constant 0 : i32
    %c0_i32_0 = arith.constant 0 : i32
    return %arg0, %c0_i32 : i32, i32
  }
  func.func @transform_1(%arg0: i32, %arg1: i32) -> (i32, i32) {
    %c0_i32 = arith.constant 0 : i32
    %c0_i32_0 = arith.constant 0 : i32
    return %c0_i32, %arg1 : i32, i32
  }
  func.func @transform_2(%arg0: i32, %arg1: i32) -> (i32, i32) {
    %c0_i32 = arith.constant 0 : i32
    %c0_i32_0 = arith.constant 0 : i32
    return %c0_i32, %arg1 : i32, i32
  }
  func.func @transform_3(%arg0: i32, %arg1: i32) -> (i32, i32) {
    %c0_i32 = arith.constant 0 : i32
    return %arg0, %arg1 : i32, i32
  }
}

</mosaic_0001>

<bundles_post_ra>
// kernel: with_layer_norm.1
= control target key start
LH: loop header
LB: loop body
LE: loop exit
PB: predicated region body
PF: predicated region fallthrough
CT: control target
= control target key end

     0   :  { %8 = vsyncpa [#allocation3], 0  ;;  %s1434_s0 = inlined_call_operand.hbm [shape: f32[512,128], index: 0, kind: input, shape index: {}]   ;;  %s1435_s1 = inlined_call_operand.vmem [shape: bf16[128,128], index: 1, kind: input, shape index: {}]   ;;  %s1436_s2 = inlined_call_operand.vmem [shape: f32[1,128], index: 2, kind: input, shape index: {}]   ;;  %s1437_s3 = inlined_call_operand.hbm [shape: f32[512,128], index: 3, kind: output, shape index: {}]  }
   0x1   :  { %10 = vsyncpa [#allocation3 + $0x1], 0 }
   0x2   :  { %11 = vsyncpa [#allocation4], 0 }
   0x3   :  { %13 = vsyncpa [#allocation4 + $0x1], 0  ;;  %s1085_s12 = smov 0   ;;  %s1087_s13 = smov 0  }
   0x4   :  { %s1089_s14 = smov 0   ;;  %s1091_s15 = smov 0  }
   0x5   :  { %s1093_s16 = smov 0   ;;  %s1095_s17 = smov 0  }
   0x6 LB: > { %s747_s18 = sadd.s32 4294967295, %s1057_s17   ;;  %s748_s19 = sadd.s32 4294967294, %s1057_s17   ;;  %s1057_s17 = sphi %s1095_s17, %s19_s17   ;;  %s1053_s16 = sphi %s1093_s16, %s1451_s16   ;;  %s1049_s15 = sphi %s1091_s15, %s1450_s15   ;;  %s1045_s14 = sphi %s1089_s14, %s1449_s14   ;;  %s1041_s13 = sphi %s1087_s13, %s1448_s13   ;;  %s1037_s12 = sphi %s1085_s12, %s1447_s12  }
   0x7   : > { %s31_s20 = sadd.s32 1, %s1053_s16  ;;  %s38_s21 = sadd.s32 1, %s1045_s14 }
   0x8   : > { %p33_p0 = scmp.ge.s32.totalorder %s31_s20, 4  ;;  %p45_p1 = scmp.ne.s32.totalorder %s1045_s14, %s1041_s13 }
   0x9   : > { %p46_p2 = scmp.eq.s32.totalorder %s1057_s17, 0  ;;  %p51_p3 = scmp.ne.s32.totalorder %s1041_s13, %s1037_s12 }
   0xa   : > { %s1453_s20 = smov (%p33_p0, %s31_s20), 0  ;;  %p52_p5 = scmp.eq.s32.totalorder %s747_s18, 0 }
   0xb   : > { %p1126_p4 = por %p46_p2, %p45_p1  ;;  %s35_s23 = ssub.s32 %s1053_s16, %s1453_s20 }
   0xc   : > { %p129_p6 = scmp.eq.s32.totalorder %s747_s18, 3  ;;  %p36_p7 = scmp.eq.s32.totalorder %s35_s23, 0 }
   0xd   : > { %p1132_p8 = por %p52_p5, %p51_p3  ;;  %p135_p10 = scmp.eq.s32.totalorder %s748_s19, 3 }
   0xe   : > { %p1136_p9 = por %p129_p6, %p45_p1  ;;  %p851_p12 = scmp.lt.s32.totalorder %s1057_s17, 4 }
   0xf   : > { %s1141_s26 = scalar_select %p36_p7, %s1045_s14, %s38_s21  }
  0x10   : > { %s1441_s25 = scalar_select %p1136_p9, 1, 0 }
  0x11   : > { %p1143_p11 = por %p135_p10, %p51_p3  ;;  %s168_s28 = sand.u32 1, %s1045_s14  }
  0x12   : > { %s753_s29 = sshll.u32 %s168_s28, 7  ;;  %s773_s30 = sshll.u32 %s1053_s16, 11 }
  0x13   : > { %s1442_s27 = scalar_select %p1143_p11, 1, 0 }
  0x14   : > { %s1153_s6 = scalar_lea.hbm %s1434_s0, %s773_s30  ;;  %s172_s7 = scalar_lea.vmem [#allocation2], %s753_s29 }
  0x15   : > { %s179_s8 = sshll.u32 %s172_s7, 4  ;;  %p1159_p13 = pnand %p851_p12, %p1126_p4  ;;  %s1155_s8 = int_to_ptr.vmem [resolvable:$true] %s179_s8 }
  0x16   : > { %s1164_s10 = scalar_lea.sflag [#allocation3], %s168_s28  ;;  %s945_s11 = scalar_lea.hbm %s1153_s6, 2048 }
  0x17   : > { %p946_p1 = scmp.ne.s32.totalorder %s1153_s6, %s945_s11  ;;  %p947_p2 = pneg %p1159_p13 }
  0x18   : > { %s950_s21 = scalar_lea.hbm %s1434_s0, 8192  ;;  %p951_p4 = scmp.lt.u32.totalorder %s1153_s6, %s1434_s0 }
  0x19   : > { %p948_p3 = pnand %p947_p2, %p946_p1  ;;  %p952_p6 = scmp.lt.u32.totalorder %s950_s21, %s945_s11 }
  0x1a   : > { %p954_p10 = scmp.lt.u32.totalorder %s945_s11, %s1153_s6 }
  0x1b   : > { %p949_p5 = pneg %p948_p3  ;;  %p953_p7 = por %p952_p6, %p951_p4 }
  0x1d   : > { %p955_p12 = por %p954_p10, %p953_p7 }
  0x1f   : > { %p956_p0 = pnand %p955_p12, %p949_p5 }
  0x21   : > { %959 = shalt.err (!%p956_p0)
}
  0x22   : > { %s960_s28 = scalar_lea.vmem %s1155_s8, 2048  ;;  %s1059_s29 = smov [#allocation2]  }
  0x23   : > { %p961_p1 = scmp.ne.s32.totalorder %s1155_s8, %s960_s28  ;;  %s965_s30 = sshll.u32 %s1059_s29, 4  ;;  %s966_s30 = int_to_ptr.vmem [resolvable:$false] %s965_s30 }
  0x24   : > { %s967_s4 = scalar_lea.vmem %s966_s30, 4096  ;;  %p968_p9 = scmp.lt.s32.totalorder %s1155_s8, %s966_s30 }
  0x25   : > { %p963_p3 = pnand %p961_p1, %p947_p2  ;;  %p969_p4 = scmp.lt.s32.totalorder %s967_s4, %s960_s28 }
  0x27   : > { %p964_p11 = pneg %p963_p3  ;;  %p970_p6 = por %p969_p4, %p968_p9 }
  0x29   : > { %p971_p7 = pnand %p970_p6, %p964_p11 }
  0x2b   : > { %974 = shalt.err (!%p971_p7)
}
  0x2c   : > { %s1060_s5 = smov 128   ;;  %s1061_s7 = smov 8  }
  0x2d   : > { %846 = dma.hbm_to_vmem [thread:$0]  (!%p1159_p13), %s1153_s6, 2048, %s1155_s8, %s1164_s10, %s1060_s5, %s1060_s5, %s1061_s7  }
  0x2e   : > { %p187_p0 = scmp.lt.s32.totalorder %s1057_s17, 5  ;;  %p1444_p2 = scmp.ge.s32.totalorder %s1057_s17, 1 }
  0x30   : > { %p188_p5 = pnand %p1444_p2, %p187_p0 }
  0x31   : > { %s1196_s11 = sand.u32 (!%p188_p5), 1, %s1041_s13  }
  0x32   : > { %191 = sbr.rel (%p188_p5) target bundleno = 632 (0x278), region = 32  ;;  %s757_s18 = sshll.u32 (!%p188_p5), %s1196_s11, 7 }
  0x33   : > { %s194_s19 = scalar_lea.sflag (!%p188_p5), [#allocation3], %s1196_s11  ;;  %s1202_s21 = scalar_lea.vmem (!%p188_p5), [#allocation2], %s757_s18 }
  0x39   : > { %1028 = dma.done.wait (%p1132_p8), %s194_s19, 2048  }
  0x3a   : > { %1030 = vsyncadd (%p1132_p8), %s194_s19, 4294965248  ;;  %v237_v0 = vld [vmem:[%s1202_s21] sm:$0xff]  ;;  %v238_v2 = vld [vmem:[%s1202_s21 + $0x8] sm:$0xff]  ;;  %s1361_s9 = scalar_lea.vmem [#allocation5], %s757_s18  ;;  %s774_s18 = sshll.u32 %s1049_s15, 11 }
  0x3b   : > { %v245_v1 = vld [vmem:[%s1202_s21 + $0x40] sm:$0xff]  ;;  %253 = vadd.xlane.f32.xlu0 %v237_v0  ;;  %v246_v3 = vld [vmem:[%s1202_s21 + $0x48] sm:$0xff]  ;;  %v239_v4 = vld [vmem:[%s1202_s21 + $0x10] sm:$0xff]  ;;  %s637_s10 = sshll.u32 %s1361_s9, 4  ;;  %s1381_s28 = scalar_lea.hbm %s1437_s3, %s774_s18  ;;  %s1383_s10 = int_to_ptr.vmem [resolvable:$true] %s637_s10 }
  0x3c   : > { %269 = vadd.xlane.f32.xlu1 %v245_v1  ;;  %v240_v5 = vld [vmem:[%s1202_s21 + $0x18] sm:$0xff]  ;;  %v247_v6 = vld [vmem:[%s1202_s21 + $0x50] sm:$0xff]  ;;  %v241_v8 = vld [vmem:[%s1202_s21 + $0x20] sm:$0xff]  ;;  %s623_s15 = scalar_lea.sflag [#allocation4], %s1196_s11  ;;  %s975_s29 = scalar_lea.vmem %s1383_s10, 2048 }
  0x3d   : > { %v248_v7 = vld [vmem:[%s1202_s21 + $0x58] sm:$0xff]  ;;  %v1218_v9 = vld [vmem:[%s1202_s21 + $0x28] sm:$0xff]  ;;  %v1222_v10 = vld [vmem:[%s1202_s21 + $0x60] sm:$0xff]  ;;  %p976_p8 = scmp.ne.s32.totalorder %s1383_s10, %s975_s29  ;;  %p1445_p9 = scmp.ne.s32.totalorder %s1441_s25, 0 }
  0x3e   : > { %v1225_v11 = vld [vmem:[%s1202_s21 + $0x68] sm:$0xff]  ;;  %v1230_v12 = vld [vmem:[%s1202_s21 + $0x30] sm:$0xff]  ;;  %v1233_v13 = vld [vmem:[%s1202_s21 + $0x38] sm:$0xff]  ;;  %s1062_s30 = smov [#allocation5]  }
  0x3f   : > { %255 = vadd.xlane.f32.xlu0 %v238_v2  ;;  %v1238_v14 = vld [vmem:[%s1202_s21 + $0x70] sm:$0xff]  ;;  %v1241_v15 = vld [vmem:[%s1202_s21 + $0x78] sm:$0xff]  ;;  %v905_v16 = vld [vmem:[%s1435_s1] sm:$0xff]   ;;  %p977_p11 = pnand %p976_p8, %p1445_p9  ;;  %s979_s4 = sshll.u32 %s1062_s30, 4  ;;  %s980_s4 = int_to_ptr.vmem [resolvable:$false] %s979_s4 }
  0x40   : > { %271 = vadd.xlane.f32.xlu1 %v246_v3  ;;  %791 = vmatprep.subr.bf16.mxu0 %v905_v16  ;;  %v906_v60 = vld [vmem:[%s1435_s1 + $0x8] sm:$0xff]   ;;  %s981_s5 = scalar_lea.vmem %s980_s4, 4096  ;;  %p982_p10 = scmp.lt.s32.totalorder %s1383_s10, %s980_s4 }
  0x41   : > { %823 = vmatprep.subr.bf16.mxu1 %v905_v16  ;;  %792 = vmatpush3.bf16.msra.mxu0 %v905_v16  ;;  %p978_p13 = pneg %p977_p11  ;;  %p983_p12 = scmp.lt.s32.totalorder %s981_s5, %s975_s29 }
  0x42   : > { %831 = vmatpush3.bf16.msra.mxu1 %v905_v16  ;;  %793 = vmatprep.subr.bf16.mxu0 %v906_v60 }
  0x43   : > { %257 = vadd.xlane.f32.xlu0 %v239_v4  ;;  %824 = vmatprep.subr.bf16.mxu1 %v906_v60  ;;  %p984_p1 = por %p983_p12, %p982_p10 }
  0x44   : > { %259 = vadd.xlane.f32.xlu1 %v240_v5 }
  0x45   : > { %794 = vmatpush3.bf16.msra.mxu0 %v906_v60  ;;  %p985_p3 = pnand %p984_p1, %p978_p13 }
  0x46   : > { %832 = vmatpush3.bf16.msra.mxu1 %v906_v60 }
  0x47   : > { %273 = vadd.xlane.f32.xlu0 %v247_v6 }
  0x48   : > { %275 = vadd.xlane.f32.xlu1 %v248_v7 }
  0x4b   : > { %261 = vadd.xlane.f32.xlu0 %v241_v8 }
  0x4c   : > { %263 = vadd.xlane.f32.xlu1 %v1218_v9 }
  0x4f   : > { %277 = vadd.xlane.f32.xlu0 %v1222_v10 }
  0x50   : > { %279 = vadd.xlane.f32.xlu1 %v1225_v11 }
  0x53   : > { %265 = vadd.xlane.f32.xlu0 %v1230_v12 }
  0x54   : > { %267 = vadd.xlane.f32.xlu1 %v1233_v13 }
  0x57   : > { %281 = vadd.xlane.f32.xlu0 %v1238_v14 }
  0x58   : > { %283 = vadd.xlane.f32.xlu1 %v1241_v15 }
  0xc8   : > { %v254_v17 = vpop.xlane.xlu0 %253 }
  0xc9   : > { %v270_v18 = vpop.xlane.xlu1 %269  ;;  %v286_v19 = vmul.f32 0.0078125, %v254_v17 }
  0xca   : > { %v294_v20 = vmul.f32 0.0078125, %v270_v18 }
  0xcb   : > { %v1248_v21 = vsub.f32 %v237_v0, %v286_v19  ;;  %v908_v19 = vld [vmem:[%s1435_s1 + $0x18] sm:$0xff]  }
  0xcc   : > { %v1250_v22 = vsub.f32 %v245_v1, %v294_v20  ;;  %v256_v23 = vpop.xlane.xlu0 %255 }
  0xcd   : > { %v272_v24 = vpop.xlane.xlu1 %271  ;;  %v287_v25 = vmul.f32 0.0078125, %v256_v23  ;;  %v318_v26 = vmul.f32 %v1248_v21, %v1248_v21  ;;  %v910_v23 = vld [vmem:[%s1435_s1 + $0x28] sm:$0xff]  }
  0xce   : > { %v295_v27 = vmul.f32 0.0078125, %v272_v24  ;;  %v326_v30 = vmul.f32 %v1250_v22, %v1250_v22  ;;  %v911_v24 = vld [vmem:[%s1435_s1 + $0x30] sm:$0xff]  }
  0xcf   : > { %v1254_v28 = vsub.f32 %v238_v2, %v287_v25  ;;  %334 = vadd.xlane.f32.xlu0 %v318_v26  ;;  %v912_v25 = vld [vmem:[%s1435_s1 + $0x38] sm:$0xff]  }
  0xd0   : > { %v1256_v29 = vsub.f32 %v246_v3, %v295_v27  ;;  %v258_v31 = vpop.xlane.xlu0 %257 }
  0xd1   : > { %v260_v32 = vpop.xlane.xlu1 %259  ;;  %v288_v33 = vmul.f32 0.0078125, %v258_v31  ;;  %v319_v34 = vmul.f32 %v1254_v28, %v1254_v28 }
  0xd2   : > { %v289_v35 = vmul.f32 0.0078125, %v260_v32  ;;  %v327_v38 = vmul.f32 %v1256_v29, %v1256_v29 }
  0xd3   : > { %v1262_v36 = vsub.f32 %v239_v4, %v288_v33  ;;  %350 = vadd.xlane.f32.xlu0 %v326_v30  ;;  %336 = vadd.xlane.f32.xlu1 %v319_v34 }
  0xd4   : > { %v1264_v37 = vsub.f32 %v240_v5, %v289_v35  ;;  %v274_v39 = vpop.xlane.xlu0 %273 }
  0xd5   : > { %v276_v40 = vpop.xlane.xlu1 %275  ;;  %v296_v41 = vmul.f32 0.0078125, %v274_v39  ;;  %v320_v42 = vmul.f32 %v1262_v36, %v1262_v36 }
  0xd6   : > { %v297_v43 = vmul.f32 0.0078125, %v276_v40  ;;  %v321_v46 = vmul.f32 %v1264_v37, %v1264_v37 }
  0xd7   : > { %v1270_v44 = vsub.f32 %v247_v6, %v296_v41  ;;  %352 = vadd.xlane.f32.xlu1 %v327_v38  ;;  %338 = vadd.xlane.f32.xlu0 %v320_v42 }
  0xd8   : > { %v1272_v45 = vsub.f32 %v248_v7, %v297_v43  ;;  %v262_v47 = vpop.xlane.xlu0 %261 }
  0xd9   : > { %v264_v48 = vpop.xlane.xlu1 %263  ;;  %v290_v49 = vmul.f32 0.0078125, %v262_v47  ;;  %v328_v50 = vmul.f32 %v1270_v44, %v1270_v44 }
  0xda   : > { %v291_v51 = vmul.f32 0.0078125, %v264_v48  ;;  %v329_v54 = vmul.f32 %v1272_v45, %v1272_v45 }
  0xdb   : > { %v1278_v52 = vsub.f32 %v241_v8, %v290_v49  ;;  %340 = vadd.xlane.f32.xlu1 %v321_v46  ;;  %354 = vadd.xlane.f32.xlu0 %v328_v50  ;;  %v907_v8 = vld [vmem:[%s1435_s1 + $0x10] sm:$0xff]  }
  0xdc   : > { %v1281_v53 = vsub.f32 %v1218_v9, %v291_v51  ;;  %v278_v55 = vpop.xlane.xlu0 %277  ;;  %795 = vmatprep.subr.bf16.mxu0 %v907_v8  ;;  %825 = vmatprep.subr.bf16.mxu1 %v907_v8 }
  0xdd   : > { %v280_v56 = vpop.xlane.xlu1 %279  ;;  %v298_v57 = vmul.f32 0.0078125, %v278_v55  ;;  %v322_v58 = vmul.f32 %v1278_v52, %v1278_v52  ;;  %796 = vmatpush3.bf16.msra.mxu0 %v907_v8  ;;  %833 = vmatpush3.bf16.msra.mxu1 %v907_v8 }
  0xde   : > { %v299_v59 = vmul.f32 0.0078125, %v280_v56  ;;  %v323_v63 = vmul.f32 %v1281_v53, %v1281_v53  ;;  %797 = vmatprep.subr.bf16.mxu0 %v908_v19  ;;  %826 = vmatprep.subr.bf16.mxu1 %v908_v19 }
  0xdf   : > { %v1291_v61 = vsub.f32 %v1222_v10, %v298_v57  ;;  %356 = vadd.xlane.f32.xlu1 %v329_v54  ;;  %342 = vadd.xlane.f32.xlu0 %v322_v58 }
  0xe0   : > { %v1294_v62 = vsub.f32 %v1225_v11, %v299_v59  ;;  %v266_v0 = vpop.xlane.xlu0 %265 }
  0xe1   : > { %v268_v1 = vpop.xlane.xlu1 %267  ;;  %v292_v2 = vmul.f32 0.0078125, %v266_v0  ;;  %v330_v3 = vmul.f32 %v1291_v61, %v1291_v61  ;;  %798 = vmatpush3.bf16.msra.mxu0 %v908_v19  ;;  %834 = vmatpush3.bf16.msra.mxu1 %v908_v19 }
  0xe2   : > { %v293_v4 = vmul.f32 0.0078125, %v268_v1  ;;  %v331_v7 = vmul.f32 %v1294_v62, %v1294_v62 }
  0xe3   : > { %v1301_v5 = vsub.f32 %v1230_v12, %v292_v2  ;;  %344 = vadd.xlane.f32.xlu1 %v323_v63  ;;  %358 = vadd.xlane.f32.xlu0 %v330_v3 }
  0xe4   : > { %v1304_v6 = vsub.f32 %v1233_v13, %v293_v4  ;;  %v282_v9 = vpop.xlane.xlu0 %281 }
  0xe5   : > { %v284_v10 = vpop.xlane.xlu1 %283  ;;  %v300_v11 = vmul.f32 0.0078125, %v282_v9  ;;  %v324_v16 = vmul.f32 %v1301_v5, %v1301_v5 }
  0xe6   : > { %v301_v12 = vmul.f32 0.0078125, %v284_v10  ;;  %v325_v18 = vmul.f32 %v1304_v6, %v1304_v6 }
  0xe7   : > { %v1314_v13 = vsub.f32 %v1238_v14, %v300_v11  ;;  %360 = vadd.xlane.f32.xlu1 %v331_v7  ;;  %346 = vadd.xlane.f32.xlu0 %v324_v16 }
  0xe8   : > { %v1317_v17 = vsub.f32 %v1241_v15, %v301_v12  ;;  %v909_v15 = vld [vmem:[%s1435_s1 + $0x20] sm:$0xff]  }
  0xe9   : > { %v332_v20 = vmul.f32 %v1314_v13, %v1314_v13  ;;  %799 = vmatprep.subr.bf16.mxu0 %v909_v15  ;;  %827 = vmatprep.subr.bf16.mxu1 %v909_v15 }
  0xea   : > { %v333_v14 = vmul.f32 %v1317_v17, %v1317_v17  ;;  %800 = vmatpush3.bf16.msra.mxu0 %v909_v15  ;;  %835 = vmatpush3.bf16.msra.mxu1 %v909_v15 }
  0xeb   : > { %348 = vadd.xlane.f32.xlu1 %v325_v18  ;;  %362 = vadd.xlane.f32.xlu0 %v332_v20 }
  0xec   : > { %801 = vmatprep.subr.bf16.mxu0 %v910_v23  ;;  %828 = vmatprep.subr.bf16.mxu1 %v910_v23 }
  0xee   : > { %802 = vmatpush3.bf16.msra.mxu0 %v910_v23  ;;  %836 = vmatpush3.bf16.msra.mxu1 %v910_v23 }
  0xef   : > { %364 = vadd.xlane.f32.xlu1 %v333_v14  ;;  %803 = vmatprep.subr.bf16.mxu0 %v911_v24 }
  0xf0   : > { %829 = vmatprep.subr.bf16.mxu1 %v911_v24 }
  0xf2   : > { %804 = vmatpush3.bf16.msra.mxu0 %v911_v24  ;;  %837 = vmatpush3.bf16.msra.mxu1 %v911_v24 }
  0xf3   : > { %805 = vmatprep.subr.bf16.mxu0 %v912_v25  ;;  %830 = vmatprep.subr.bf16.mxu1 %v912_v25 }
  0xf6   : > { %806 = vmatpush3.bf16.msra.mxu0 %v912_v25  ;;  %838 = vmatpush3.bf16.msra.mxu1 %v912_v25 }
 0x15c   : > { %v335_v26 = vpop.xlane.xlu0 %334 }
 0x15d   : > { %v366_v27 = vmul.f32 0.0078125, %v335_v26 }
 0x15f   : > { %v382_v30 = vadd.f32 1e-05, %v366_v27 }
 0x160   : > { %v337_v31 = vpop.xlane.xlu1 %336  ;;  %v351_v32 = vpop.xlane.xlu0 %350 }
 0x161   : > { %v367_v33 = vmul.f32 0.0078125, %v337_v31  ;;  %v374_v34 = vmul.f32 0.0078125, %v351_v32  ;;  %913 = vrsqrt.f32 %v382_v30 }
 0x163   : > { %v383_v35 = vadd.f32 1e-05, %v367_v33  ;;  %v390_v38 = vadd.f32 1e-05, %v374_v34 }
 0x164   : > { %v353_v39 = vpop.xlane.xlu1 %352  ;;  %v339_v40 = vpop.xlane.xlu0 %338 }
 0x165   : > { %915 = vrsqrt.f32 %v383_v35  ;;  %v375_v41 = vmul.f32 0.0078125, %v353_v39  ;;  %v368_v42 = vmul.f32 0.0078125, %v339_v40 }
 0x166   : > { %917 = vrsqrt.f32 %v390_v38 }
 0x167   : > { %v391_v43 = vadd.f32 1e-05, %v375_v41  ;;  %v384_v46 = vadd.f32 1e-05, %v368_v42 }
 0x168   : > { %v341_v47 = vpop.xlane.xlu1 %340  ;;  %v355_v48 = vpop.xlane.xlu0 %354 }
 0x169   : > { %919 = vrsqrt.f32 %v391_v43  ;;  %v369_v49 = vmul.f32 0.0078125, %v341_v47  ;;  %v376_v50 = vmul.f32 0.0078125, %v355_v48 }
 0x16a   : > { %921 = vrsqrt.f32 %v384_v46 }
 0x16b   : > { %v385_v51 = vadd.f32 1e-05, %v369_v49  ;;  %v392_v54 = vadd.f32 1e-05, %v376_v50  ;;  %v914_v57 = vpop.eup %913 }
 0x16c   : > { %v357_v55 = vpop.xlane.xlu1 %356  ;;  %v343_v56 = vpop.xlane.xlu0 %342  ;;  %v414_v3 = vmul.f32 %v914_v57, %v1248_v21 }
 0x16d   : > { %923 = vrsqrt.f32 %v385_v51  ;;  %v377_v58 = vmul.f32 0.0078125, %v357_v55  ;;  %v370_v59 = vmul.f32 0.0078125, %v343_v56 }
 0x16e   : > { %925 = vrsqrt.f32 %v392_v54 }
 0x16f   : > { %v916_v60 = vpop.eup %915  ;;  %v393_v63 = vadd.f32 1e-05, %v377_v58  ;;  %v386_v0 = vadd.f32 1e-05, %v370_v59 }
 0x170   : > { %v345_v1 = vpop.xlane.xlu1 %344  ;;  %v359_v2 = vpop.xlane.xlu0 %358  ;;  %v415_v4 = vmul.f32 %v916_v60, %v1254_v28 }
 0x171   : > { %v918_v7 = vpop.eup %917  ;;  %927 = vrsqrt.f32 %v393_v63  ;;  %v371_v8 = vmul.f32 0.0078125, %v345_v1  ;;  %v378_v9 = vmul.f32 0.0078125, %v359_v2 }
 0x172   : > { %v430_v10 = vpack.c.bf16 %v415_v4, %v414_v3  ;;  %929 = vrsqrt.f32 %v386_v0  ;;  %v422_v20 = vmul.f32 %v918_v7, %v1250_v22 }
 0x173   : > { %v920_v11 = vpop.eup %919  ;;  %v387_v16 = vadd.f32 1e-05, %v371_v8  ;;  %v394_v12 = vadd.f32 1e-05, %v378_v9 }
 0x174   : > { %v361_v18 = vpop.xlane.xlu1 %360  ;;  %807 = vmatprep.mubr.bf16.mxu0 %v430_v10  ;;  %v347_v19 = vpop.xlane.xlu0 %346  ;;  %v423_v14 = vmul.f32 %v920_v11, %v1256_v29 }
 0x175   : > { %v922_v15 = vpop.eup %921  ;;  %931 = vrsqrt.f32 %v387_v16  ;;  %v379_v21 = vmul.f32 0.0078125, %v361_v18  ;;  %v372_v28 = vmul.f32 0.0078125, %v347_v19 }
 0x176   : > { %v434_v23 = vpack.c.bf16 %v423_v14, %v422_v20  ;;  %933 = vrsqrt.f32 %v394_v12  ;;  %v416_v31 = vmul.f32 %v922_v15, %v1262_v36 }
 0x177   : > { %v924_v24 = vpop.eup %923  ;;  %v395_v25 = vadd.f32 1e-05, %v379_v21  ;;  %v388_v26 = vadd.f32 1e-05, %v372_v28 }
 0x178   : > { %v349_v27 = vpop.xlane.xlu1 %348  ;;  %815 = vmatprep.mubr.bf16.mxu1 %v434_v23  ;;  %v363_v30 = vpop.xlane.xlu0 %362  ;;  %v417_v32 = vmul.f32 %v924_v24, %v1264_v37 }
 0x179   : > { %v926_v33 = vpop.eup %925  ;;  %935 = vrsqrt.f32 %v395_v25  ;;  %v373_v22 = vmul.f32 0.0078125, %v349_v27  ;;  %v380_v29 = vmul.f32 0.0078125, %v363_v30 }
 0x17a   : > { %v431_v34 = vpack.c.bf16 %v417_v32, %v416_v31  ;;  %937 = vrsqrt.f32 %v388_v26  ;;  %v424_v41 = vmul.f32 %v926_v33, %v1270_v44 }
 0x17b   : > { %v928_v35 = vpop.eup %927  ;;  %v389_v38 = vadd.f32 1e-05, %v373_v22  ;;  %v396_v39 = vadd.f32 1e-05, %v380_v29 }
 0x17c   : > { %v365_v40 = vpop.xlane.xlu1 %364  ;;  %808 = vmatmul.mubr.bf16.vlgmr.msra.gmra.mrb[0].mxu0 %v431_v34  ;;  %v425_v42 = vmul.f32 %v928_v35, %v1272_v45  ;;  %v930_v43 = vpop.eup %929 }
 0x17d   : > { %939 = vrsqrt.f32 %v389_v38  ;;  %v381_v36 = vmul.f32 0.0078125, %v365_v40  ;;  %v418_v48 = vmul.f32 %v930_v43, %v1278_v52 }
 0x17e   : > { %v435_v46 = vpack.c.bf16 %v425_v42, %v424_v41  ;;  %941 = vrsqrt.f32 %v396_v39 }
 0x17f   : > { %v932_v37 = vpop.eup %931  ;;  %v397_v47 = vadd.f32 1e-05, %v381_v36 }
 0x180   : > { %816 = vmatmul.mubr.bf16.vlgmr.msra.gmra.mrb[0].mxu1 %v435_v46  ;;  %v419_v49 = vmul.f32 %v932_v37, %v1281_v53  ;;  %v934_v50 = vpop.eup %933 }
 0x181   : > { %943 = vrsqrt.f32 %v397_v47  ;;  %v426_v44 = vmul.f32 %v934_v50, %v1291_v61 }
 0x182   : > { %v432_v51 = vpack.c.bf16 %v419_v49, %v418_v48 }
 0x183   : > { %v936_v54 = vpop.eup %935 }
 0x184   : > { %811 = vmatprep.mubr.bf16.mxu0 %v432_v51  ;;  %v427_v45 = vmul.f32 %v936_v54, %v1294_v62  ;;  %v938_v55 = vpop.eup %937  ;;  %v759_v62 = vld [vmem:[%s1436_s2] ss:$0 sm:$0xff] }
 0x185   : > { %v420_v58 = vmul.f32 %v938_v55, %v1301_v5 }
 0x186   : > { %v436_v56 = vpack.c.bf16 %v427_v45, %v426_v44 }
 0x187   : > { %v940_v57 = vpop.eup %939 }
 0x188   : > { %819 = vmatprep.mubr.bf16.mxu1 %v436_v56  ;;  %v421_v52 = vmul.f32 %v940_v57, %v1304_v6  ;;  %v942_v59 = vpop.eup %941 }
 0x189   : > { %v428_v63 = vmul.f32 %v942_v59, %v1314_v13 }
 0x18a   : > { %v433_v53 = vpack.c.bf16 %v421_v52, %v420_v58 }
 0x18b   : > { %v944_v60 = vpop.eup %943 }
 0x18c   : > { %812 = vmatmul.mubr.bf16.gmra.mrb[4].mxu0 %v433_v53  ;;  %v429_v0 = vmul.f32 %v944_v60, %v1317_v17 }
 0x18e   : > { %v437_v61 = vpack.c.bf16 %v429_v0, %v428_v63 }
 0x190   : > { %820 = vmatmul.mubr.bf16.gmra.mrb[4].mxu1 %v437_v61 }
 0x24f   : > { %v809_v1 = vpop.f32.mrb[0].mxu0 }
 0x250   : > { %v552_v2 = vadd.f32 %v809_v1, %v759_v62  ;;  %v543_v5 = vpop.f32.mrb[1].mxu0 }
 0x251   : > { %v544_v3 = vadd.f32 %v759_v62, %v543_v5  ;;  %v810_v4 = vpop.f32.mrb[2].mxu0 }
 0x252   : > { %608 = vst [vmem:[%s1361_s9 + $0x10] sm:$0xff] %v552_v2  ;;  %v555_v6 = vadd.f32 %v810_v4, %v759_v62  ;;  %v546_v13 = vpop.f32.mrb[3].mxu0 }
 0x253   : > { %606 = vst [vmem:[%s1361_s9] sm:$0xff] %v544_v3  ;;  %v547_v17 = vadd.f32 %v759_v62, %v546_v13  ;;  %v817_v7 = vpop.f32.mrb[0].mxu1 }
 0x254   : > { %609 = vst [vmem:[%s1361_s9 + $0x18] sm:$0xff] %v555_v6  ;;  %v584_v8 = vadd.f32 %v817_v7, %v759_v62  ;;  %v575_v9 = vpop.f32.mrb[1].mxu1 }
 0x255   : > { %607 = vst [vmem:[%s1361_s9 + $0x8] sm:$0xff] %v547_v17  ;;  %v576_v10 = vadd.f32 %v759_v62, %v575_v9  ;;  %v818_v11 = vpop.f32.mrb[2].mxu1 }
 0x256   : > { %616 = vst [vmem:[%s1361_s9 + $0x50] sm:$0xff] %v584_v8  ;;  %v587_v16 = vadd.f32 %v818_v11, %v759_v62  ;;  %v578_v12 = vpop.f32.mrb[3].mxu1 }
 0x257   : > { %614 = vst [vmem:[%s1361_s9 + $0x40] sm:$0xff] %v576_v10  ;;  %v579_v18 = vadd.f32 %v759_v62, %v578_v12 }
 0x258   : > { %617 = vst [vmem:[%s1361_s9 + $0x58] sm:$0xff] %v587_v16 }
 0x259   : > { %615 = vst [vmem:[%s1361_s9 + $0x48] sm:$0xff] %v579_v18 }
 0x25f   : > { %v813_v19 = vpop.f32.mrb[4].mxu0 }
 0x260   : > { %v568_v20 = vadd.f32 %v813_v19, %v759_v62  ;;  %v559_v14 = vpop.f32.mrb[5].mxu0 }
 0x261   : > { %v560_v15 = vadd.f32 %v759_v62, %v559_v14  ;;  %v814_v21 = vpop.f32.mrb[6].mxu0 }
 0x262   : > { %612 = vst [vmem:[%s1361_s9 + $0x30] sm:$0xff] %v568_v20  ;;  %v571_v28 = vadd.f32 %v814_v21, %v759_v62  ;;  %v562_v23 = vpop.f32.mrb[7].mxu0 }
 0x263   : > { %610 = vst [vmem:[%s1361_s9 + $0x20] sm:$0xff] %v560_v15  ;;  %v563_v24 = vadd.f32 %v759_v62, %v562_v23  ;;  %v821_v25 = vpop.f32.mrb[4].mxu1 }
 0x264   : > { %613 = vst [vmem:[%s1361_s9 + $0x38] sm:$0xff] %v571_v28  ;;  %v600_v26 = vadd.f32 %v821_v25, %v759_v62  ;;  %v591_v27 = vpop.f32.mrb[5].mxu1 }
 0x265   : > { %611 = vst [vmem:[%s1361_s9 + $0x28] sm:$0xff] %v563_v24  ;;  %v592_v30 = vadd.f32 %v759_v62, %v591_v27  ;;  %v822_v31 = vpop.f32.mrb[6].mxu1 }
 0x266   : > { %620 = vst [vmem:[%s1361_s9 + $0x70] sm:$0xff] %v600_v26  ;;  %v603_v32 = vadd.f32 %v822_v31, %v759_v62  ;;  %v594_v33 = vpop.f32.mrb[7].mxu1 }
 0x267   : > { %618 = vst [vmem:[%s1361_s9 + $0x60] sm:$0xff] %v592_v30  ;;  %v595_v22 = vadd.f32 %v759_v62, %v594_v33 }
 0x268   : > { %621 = vst [vmem:[%s1361_s9 + $0x78] sm:$0xff] %v603_v32 }
 0x269   : > { %619 = vst [vmem:[%s1361_s9 + $0x68] sm:$0xff] %v595_v22 }
 0x26a   : > { %988 = shalt.err (!%p985_p3)
}
 0x26b   : > { %s989_s7 = scalar_lea.hbm %s1381_s28, 2048  ;;  %s993_s24 = scalar_lea.hbm %s1437_s3, 8192 }
 0x26c   : > { %p990_p4 = scmp.ne.s32.totalorder %s1381_s28, %s989_s7  ;;  %p994_p0 = scmp.lt.u32.totalorder %s1381_s28, %s1437_s3 }
 0x26d   : > { %p995_p2 = scmp.lt.u32.totalorder %s993_s24, %s989_s7  ;;  %p997_p8 = scmp.lt.u32.totalorder %s989_s7, %s1381_s28 }
 0x26e   : > { %p991_p6 = pnand %p990_p4, %p1445_p9 }
 0x26f   : > { %p996_p5 = por %p995_p2, %p994_p0 }
 0x270   : > { %p992_p7 = pneg %p991_p6 }
 0x271   : > { %p998_p11 = por %p997_p8, %p996_p5 }
 0x273   : > { %p999_p13 = pnand %p998_p11, %p992_p7 }
 0x275   : > { %1002 = shalt.err (!%p999_p13)
}
 0x276   : > { %s1063_s9 = smov 128   ;;  %s1064_s18 = smov 8  }
 0x277   : > { %841 = dma.vmem_to_hbm [thread:$0]  (%p1445_p9), %s1383_s10, 2048, %s1381_s28, %s623_s15, %s1063_s9, %s1063_s9, %s1064_s18  }
 0x278 PF: > { %p852_p10 = scmp.ge.s32.totalorder %s1057_s17, 2  ;;  %s652_s22 = sand.u32 1, %s1037_s12  }
 0x279   : > { %p1446_p12 = scmp.ne.s32.totalorder %s1442_s27, 0  ;;  %s653_s23 = scalar_lea.sflag [#allocation4], %s652_s22 }
 0x27b   : > { %p848_p1 = pnand %p852_p10, %p1446_p12 }
 0x27d   : > { %1032 = dma.done.wait (!%p848_p1), %s653_s23, 2048  }
 0x27e   : > { %1034 = vsyncadd (!%p848_p1), %s653_s23, 4294965248  ;;  %s19_s17 = sadd.s32 1, %s1057_s17   ;;  %s1447_s12 = smov %s1041_s13 }
 0x27f   : > { %p16_p3 = scmp.ge.s32.totalorder %s19_s17, 6   ;;  %s1448_s13 = smov %s1045_s14 }
 0x280   : > { %s1449_s14 = smov %s1141_s26  ;;  %s1450_s15 = smov %s1053_s16 }
 0x281   : > { %s1451_s16 = smov %s1453_s20  ;;  %18 = sbr.rel (!%p16_p3) target bundleno = 6 (0x6), region = 83 }
 0x288   :  { %658 = vsyncpa [#allocation3], 1 }
 0x289   :  { %660 = vsyncpa [#allocation3 + $0x1], 1 }
 0x28a   :  { %661 = vsyncpa [#allocation4], 1 }
 0x28b   :  { %663 = vsyncpa [#allocation4 + $0x1], 1 }

</bundles_post_ra>
